<compile_context>
chip_gen: v6e
topology: v6e:2x2x1
jax: 0.10.0
libtpu: 0.0.40
codegen_flags: <defaults>
</compile_context>

<pallas_src>
import math

import jax
import jax.numpy as jnp
from jax import lax
from jax.experimental import pallas as pl
from jax.experimental.pallas import tpu as pltpu

_INV_SQRT2 = 1.0 / math.sqrt(2.0)


def _round_up(a: int, b: int) -> int:
    return ((a + b - 1) // b) * b


def _cdiv(a: int, b: int) -> int:
    return (a + b - 1) // b


def _chip_defaults():
    """Per-generation tile sizes and VMEM budget (advisory; clamped to the problem)."""
    kind = ""
    try:
        kind = jax.devices()[0].device_kind.lower()
    except Exception:
        pass
    if "v7" in kind:
        # v7x: 64 MiB VMEM/TC but 3.2 TB/s HBM -> tm=512 is already compute-bound; 2 TCs.
        return dict(tm=512, tk=512, vmem_limit=56 * 1024 * 1024, cores=2)
    if "v6" in kind:
        # v6e: needs ~650+ flops/byte on weight traffic -> large token tile, big VMEM budget.
        return dict(tm=1024, tk=512, vmem_limit=100 * 1024 * 1024, cores=1)
    if "v5" in kind:
        # v5e: roofline threshold ~240 flops/byte; tm=512 with raised scoped-VMEM limit.
        return dict(tm=512, tk=512, vmem_limit=80 * 1024 * 1024, cores=1)
    # Unknown chip: conservative tiles that fit a 64 MiB VMEM budget.
    return dict(tm=512, tk=512, vmem_limit=56 * 1024 * 1024, cores=1)


def _ffn_kernel(x_ref, w1_ref, b1_ref, w2_ref, b2_ref, o_ref, acc_ref):
    # x_ref:   (tm, dim_p)      token tile (compute dtype, e.g. bf16)
    # w1_ref:  (dim_p, tk)      column slice of W1
    # b1_ref:  (1, tk)          slice of b1 (f32)
    # w2_ref:  (tk, out_p)      row slice of W2
    # b2_ref:  (1, out_p)       b2 (f32)
    # o_ref:   (tm, out_p)      output tile
    # acc_ref: (tm, out_p) f32  VMEM accumulator, persists across the hidden axis
    k = pl.program_id(1)
    nk = pl.num_programs(1)

    # fc1 partial: (tm, tk), f32 accumulation on the MXU.
    h = jnp.dot(x_ref[...], w1_ref[...], preferred_element_type=jnp.float32)
    h = h + b1_ref[...]
    # Exact erf GELU (torch.nn.GELU() default), in f32 on the VPU/EUP (hidden under MXU).
    h = 0.5 * h * (1.0 + lax.erf(h * _INV_SQRT2))
    # TODO(synk): nn.Dropout is identity in eval mode; training-mode RNG dropout not implemented.

    # fc2 partial contribution for this hidden slice, f32.
    contrib = jnp.dot(h.astype(w2_ref.dtype), w2_ref[...],
                      preferred_element_type=jnp.float32)

    @pl.when(k == 0)
    def _init():
        acc_ref[...] = jnp.zeros_like(acc_ref)

    @pl.when(k < nk - 1)
    def _accumulate():
        acc_ref[...] += contrib

    @pl.when(k == nk - 1)
    def _finalize():
        # Fused last step: single accumulator read, no final read-modify-write pass.
        o_ref[...] = (acc_ref[...] + contrib + b2_ref[...]).astype(o_ref.dtype)


def prepare_ffn_params(w1, b1, w2, b2, *, tk=512, compute_dtype=jnp.bfloat16):
    """One-time weight cast + zero-pad, hoisted out of the per-call path.

    w1: (dim, hidden), b1: (hidden,), w2: (hidden, out_dim), b2: (out_dim,).
    """
    dim, hidden = w1.shape
    out_dim = w2.shape[1]
    dim_p = _round_up(dim, 128)
    out_p = _round_up(out_dim, 128)
    tk = min(tk, _round_up(hidden, 128))
    hidden_p = _round_up(hidden, tk)  # contracted dim must be zero-padded to the tile

    w1_p = jnp.pad(w1.astype(compute_dtype), ((0, dim_p - dim), (0, hidden_p - hidden)))
    b1_p = jnp.pad(b1.astype(jnp.float32), (0, hidden_p - hidden)).reshape(1, hidden_p)
    w2_p = jnp.pad(w2.astype(compute_dtype), ((0, hidden_p - hidden), (0, out_p - out_dim)))
    b2_p = jnp.pad(b2.astype(jnp.float32), (0, out_p - out_dim)).reshape(1, out_p)

    meta = dict(dim=dim, hidden=hidden, out_dim=out_dim,
                dim_p=dim_p, hidden_p=hidden_p, out_p=out_p,
                tk=tk, compute_dtype=compute_dtype)
    return (w1_p, b1_p, w2_p, b2_p), meta


def feed_forward(x, prepared_params, meta, *, tm=None, vmem_limit=None):
    """x: (B, S, dim). prepared_params/meta from prepare_ffn_params()."""
    w1_p, b1_p, w2_p, b2_p = prepared_params
    dim = meta["dim"]
    out_dim = meta["out_dim"]
    dim_p, hidden_p, out_p = meta["dim_p"], meta["hidden_p"], meta["out_p"]
    tk = meta["tk"]
    compute_dtype = meta["compute_dtype"]

    defaults = _chip_defaults()
    if tm is None:
        tm = defaults["tm"]
    if vmem_limit is None:
        vmem_limit = defaults["vmem_limit"]
    cores = defaults.get("cores", 1)

    B, S, _ = x.shape
    M = B * S
    out_dtype = x.dtype

    # Token tile: clamp to the problem size; on multi-core chips keep >= `cores` tiles
    # so the "parallel" token axis actually feeds every TensorCore.
    tm = min(tm, _round_up(M, 8))
    if cores > 1 and M > 128 and _cdiv(M, tm) < cores:
        tm = max(128, _round_up(_cdiv(M, cores), 128))
    grid_m = _cdiv(M, tm)
    grid_k = hidden_p // tk

    # Only the contracted feature dim needs zero-padding for correctness; ragged M is
    # handled by the grid (out-of-range rows are masked on the store), so no token-dim
    # padding copy is materialized. The pad/cast below fold away when already aligned.
    x2 = x.reshape(M, dim).astype(compute_dtype)
    x_p = jnp.pad(x2, ((0, 0), (0, dim_p - dim)))

    itemsize = jnp.dtype(compute_dtype).itemsize
    m_eff = grid_m * tm
    cost = pl.CostEstimate(
        flops=2 * m_eff * (dim_p * hidden_p + hidden_p * out_p),
        transcendentals=m_eff * hidden_p,
        # Weights are re-streamed from HBM once per token tile.
        bytes_accessed=(x_p.size * itemsize
                        + grid_m * (w1_p.size + w2_p.size) * itemsize
                        + (b1_p.size + b2_p.size) * 4
                        + M * out_p * jnp.dtype(out_dtype).itemsize),
    )

    out = pl.pallas_call(
        _ffn_kernel,
        out_shape=jax.ShapeDtypeStruct((M, out_p), out_dtype),
        grid_spec=pltpu.PrefetchScalarGridSpec(
            num_scalar_prefetch=0,
            grid=(grid_m, grid_k),
            in_specs=[
                pl.BlockSpec((tm, dim_p), lambda i, k: (i, 0)),     # x token tile
                pl.BlockSpec((dim_p, tk), lambda i, k: (0, k)),     # W1 column slice
                pl.BlockSpec((1, tk), lambda i, k: (0, k)),         # b1 slice
                pl.BlockSpec((tk, out_p), lambda i, k: (k, 0)),     # W2 row slice
                pl.BlockSpec((1, out_p), lambda i, k: (0, 0)),      # b2
            ],
            out_specs=pl.BlockSpec((tm, out_p), lambda i, k: (i, 0)),
            scratch_shapes=[pltpu.VMEM((tm, out_p), jnp.float32)],
        ),
        compiler_params=pltpu.CompilerParams(
            dimension_semantics=("parallel", "arbitrary"),
            vmem_limit_bytes=vmem_limit,
        ),
        cost_estimate=cost,
    )(x_p, w1_p, b1_p, w2_p, b2_p)

    return out[:, :out_dim].reshape(B, S, out_dim)


def _ref_feed_forward(x, w1, b1, w2, b2):
    h = jnp.einsum("bsd,dh->bsh", x, w1) + b1
    h = 0.5 * h * (1.0 + lax.erf(h / math.sqrt(2.0)))
    return jnp.einsum("bsh,ho->bso", h, w2) + b2


if __name__ == "__main__":
    # Small shapes consistent with the module: batch=2, seq=8, dim=32, hidden=64, out_dim=dim.
    B, S, dim, hidden = 2, 8, 32, 64
    out_dim = dim  # out_dim=None -> out_dim=dim

    key = jax.random.PRNGKey(0)
    kx, k1, k2, k3, k4 = jax.random.split(key, 5)

    x = jax.random.normal(kx, (B, S, dim), dtype=jnp.float32)

    # Deterministic parameter init (PyTorch Linear-style uniform bounds),
    # stored pre-transposed: (in_features, out_features).
    bound1 = 1.0 / math.sqrt(dim)
    bound2 = 1.0 / math.sqrt(hidden)
    w1 = jax.random.uniform(k1, (dim, hidden), jnp.float32, -bound1, bound1)
    b1 = jax.random.uniform(k2, (hidden,), jnp.float32, -bound1, bound1)
    w2 = jax.random.uniform(k3, (hidden, out_dim), jnp.float32, -bound2, bound2)
    b2 = jax.random.uniform(k4, (out_dim,), jnp.float32, -bound2, bound2)

    # Weight cast/pad is done once, outside the per-call path.
    params, meta = prepare_ffn_params(w1, b1, w2, b2)
    params = jax.block_until_ready(params)

    y = feed_forward(x, params, meta)
    y = jax.block_until_ready(y)

    y_ref = _ref_feed_forward(x, w1, b1, w2, b2)
    assert y.shape == (B, S, out_dim)
    # bf16 operands with f32 accumulation -> loosened tolerance vs the f32 reference.
    assert jnp.allclose(y, y_ref, atol=2e-2, rtol=2e-2), "mismatch vs reference"

    print("KERNEL_OK")
</pallas_src>

<mosaic_0001>
module attributes {stable_mosaic.version = 11 : i64} {
  func.func @_ffn_kernel(%arg0: i32, %arg1: i32, %arg2: memref<16x128xbf16, #tpu.memory_space<vmem>>, %arg3: memref<128x128xbf16, #tpu.memory_space<vmem>>, %arg4: memref<1x128xf32, #tpu.memory_space<vmem>>, %arg5: memref<128x128xbf16, #tpu.memory_space<vmem>>, %arg6: memref<1x128xf32, #tpu.memory_space<vmem>>, %arg7: memref<16x128xf32, #tpu.memory_space<vmem>>, %arg8: memref<16x128xf32, #tpu.memory_space<vmem>>) attributes {dimension_semantics = [#tpu.dimension_semantics<parallel>, #tpu.dimension_semantics<arbitrary>], iteration_bounds = array<i64: 1, 1>, scalar_prefetch = 0 : i64, scratch_operands = 1 : i64, tpu.core_type = #tpu.core_type<tc>, window_params = [{transform_indices = @transform_0, window_bounds = array<i64: 16, 128>}, {transform_indices = @transform_1, window_bounds = array<i64: 128, 128>}, {transform_indices = @transform_2, window_bounds = array<i64: 1, 128>}, {transform_indices = @transform_3, window_bounds = array<i64: 128, 128>}, {pipeline_mode = #tpu.pipeline_mode<synchronous>, transform_indices = @transform_4, window_bounds = array<i64: 1, 128>}, {transform_indices = @transform_5, window_bounds = array<i64: 16, 128>}]} {
    %c0 = arith.constant 0 : index
    %c0_0 = arith.constant 0 : index
    %0 = vector.load %arg2[%c0, %c0_0] : memref<16x128xbf16, #tpu.memory_space<vmem>>, vector<16x128xbf16>
    %c0_1 = arith.constant 0 : index
    %c0_2 = arith.constant 0 : index
    %1 = vector.load %arg3[%c0_1, %c0_2] : memref<128x128xbf16, #tpu.memory_space<vmem>>, vector<128x128xbf16>
    %cst = arith.constant dense<0.000000e+00> : vector<16x128xf32>
    %2 = tpu.matmul %0, %1, %cst {dimension_numbers = #tpu.dot_dimension_numbers<[1], [0], [0], [1], [0, 0, 1, 1], [], []>} : vector<16x128xbf16>, vector<128x128xbf16>, vector<16x128xf32> -> vector<16x128xf32>
    %c0_3 = arith.constant 0 : index
    %c0_4 = arith.constant 0 : index
    %3 = vector.load %arg4[%c0_3, %c0_4] : memref<1x128xf32, #tpu.memory_space<vmem>>, vector<1x128xf32>
    %4 = vector.broadcast %3 : vector<1x128xf32> to vector<16x128xf32>
    %5 = arith.addf %2, %4 : vector<16x128xf32>
    %cst_5 = arith.constant 5.000000e-01 : f32
    %6 = vector.broadcast %cst_5 : f32 to vector<16x128xf32>
    %7 = arith.mulf %6, %5 : vector<16x128xf32>
    %cst_6 = arith.constant 0.707106769 : f32
    %8 = vector.broadcast %cst_6 : f32 to vector<16x128xf32>
    %9 = arith.mulf %5, %8 : vector<16x128xf32>
    %10 = math.erf %9 : vector<16x128xf32>
    %cst_7 = arith.constant 1.000000e+00 : f32
    %11 = vector.broadcast %cst_7 : f32 to vector<16x128xf32>
    %12 = arith.addf %11, %10 : vector<16x128xf32>
    %13 = arith.mulf %7, %12 : vector<16x128xf32>
    %14 = arith.truncf %13 : vector<16x128xf32> to vector<16x128xbf16>
    %c0_8 = arith.constant 0 : index
    %c0_9 = arith.constant 0 : index
    %15 = vector.load %arg5[%c0_8, %c0_9] : memref<128x128xbf16, #tpu.memory_space<vmem>>, vector<128x128xbf16>
    %cst_10 = arith.constant dense<0.000000e+00> : vector<16x128xf32>
    %16 = tpu.matmul %14, %15, %cst_10 {dimension_numbers = #tpu.dot_dimension_numbers<[1], [0], [0], [1], [0, 0, 1, 1], [], []>} : vector<16x128xbf16>, vector<128x128xbf16>, vector<16x128xf32> -> vector<16x128xf32>
    %c0_i32 = arith.constant 0 : i32
    %17 = arith.cmpi eq, %arg1, %c0_i32 : i32
    %18 = arith.extui %17 : i1 to i32
    %c0_i32_11 = arith.constant 0 : i32
    %19 = arith.cmpi ne, %18, %c0_i32_11 : i32
    scf.if %19 {
      %cst_16 = arith.constant 0.000000e+00 : f32
      %26 = vector.broadcast %cst_16 : f32 to vector<16x128xf32>
      %c0_17 = arith.constant 0 : index
      %c0_18 = arith.constant 0 : index
      %27 = vector.load %arg8[%c0_17, %c0_18] : memref<16x128xf32, #tpu.memory_space<vmem>>, vector<16x128xf32>
      tpu.vector_store %arg8[%c0_17, %c0_18], %26 {strides = array<i32>} : memref<16x128xf32, #tpu.memory_space<vmem>>, vector<16x128xf32>,
    } else {
    }
    %c0_i32_12 = arith.constant 0 : i32
    %20 = arith.cmpi slt, %arg1, %c0_i32_12 : i32
    %21 = arith.extui %20 : i1 to i32
    %c0_i32_13 = arith.constant 0 : i32
    %22 = arith.cmpi ne, %21, %c0_i32_13 : i32
    scf.if %22 {
      %c0_16 = arith.constant 0 : index
      %c0_17 = arith.constant 0 : index
      %26 = vector.load %arg8[%c0_16, %c0_17] : memref<16x128xf32, #tpu.memory_space<vmem>>, vector<16x128xf32>
      %27 = arith.addf %26, %16 : vector<16x128xf32>
      %c0_18 = arith.constant 0 : index
      %c0_19 = arith.constant 0 : index
      %28 = vector.load %arg8[%c0_18, %c0_19] : memref<16x128xf32, #tpu.memory_space<vmem>>, vector<16x128xf32>
      tpu.vector_store %arg8[%c0_18, %c0_19], %27 {strides = array<i32>} : memref<16x128xf32, #tpu.memory_space<vmem>>, vector<16x128xf32>,
    } else {
    }
    %c0_i32_14 = arith.constant 0 : i32
    %23 = arith.cmpi eq, %arg1, %c0_i32_14 : i32
    %24 = arith.extui %23 : i1 to i32
    %c0_i32_15 = arith.constant 0 : i32
    %25 = arith.cmpi ne, %24, %c0_i32_15 : i32
    scf.if %25 {
      %c0_16 = arith.constant 0 : index
      %c0_17 = arith.constant 0 : index
      %26 = vector.load %arg8[%c0_16, %c0_17] : memref<16x128xf32, #tpu.memory_space<vmem>>, vector<16x128xf32>
      %27 = arith.addf %26, %16 : vector<16x128xf32>
      %c0_18 = arith.constant 0 : index
      %c0_19 = arith.constant 0 : index
      %28 = vector.load %arg6[%c0_18, %c0_19] : memref<1x128xf32, #tpu.memory_space<vmem>>, vector<1x128xf32>
      %29 = vector.broadcast %28 : vector<1x128xf32> to vector<16x128xf32>
      %30 = arith.addf %27, %29 : vector<16x128xf32>
      %c0_20 = arith.constant 0 : index
      %c0_21 = arith.constant 0 : index
      %31 = vector.load %arg7[%c0_20, %c0_21] : memref<16x128xf32, #tpu.memory_space<vmem>>, vector<16x128xf32>
      tpu.vector_store %arg7[%c0_20, %c0_21], %30 {strides = array<i32>} : memref<16x128xf32, #tpu.memory_space<vmem>>, vector<16x128xf32>,
    } else {
    }
    return
  }
  func.func @transform_0(%arg0: i32, %arg1: i32) -> (i32, i32) {
    %c0_i32 = arith.constant 0 : i32
    %c0_i32_0 = arith.constant 0 : i32
    return %arg0, %c0_i32 : i32, i32
  }
  func.func @transform_1(%arg0: i32, %arg1: i32) -> (i32, i32) {
    %c0_i32 = arith.constant 0 : i32
    %c0_i32_0 = arith.constant 0 : i32
    return %c0_i32, %arg1 : i32, i32
  }
  func.func @transform_2(%arg0: i32, %arg1: i32) -> (i32, i32) {
    %c0_i32 = arith.constant 0 : i32
    %c0_i32_0 = arith.constant 0 : i32
    return %c0_i32, %arg1 : i32, i32
  }
  func.func @transform_3(%arg0: i32, %arg1: i32) -> (i32, i32) {
    %c0_i32 = arith.constant 0 : i32
    %c0_i32_0 = arith.constant 0 : i32
    return %arg1, %c0_i32 : i32, i32
  }
  func.func @transform_4(%arg0: i32, %arg1: i32) -> (i32, i32) {
    %c0_i32 = arith.constant 0 : i32
    %c0_i32_0 = arith.constant 0 : i32
    %c0_i32_1 = arith.constant 0 : i32
    return %c0_i32, %c0_i32_0 : i32, i32
  }
  func.func @transform_5(%arg0: i32, %arg1: i32) -> (i32, i32) {
    %c0_i32 = arith.constant 0 : i32
    %c0_i32_0 = arith.constant 0 : i32
    return %arg0, %c0_i32 : i32, i32
  }
}

</mosaic_0001>

<bundles_post_ra>
// kernel: tpu_custom_call.1
= control target key start
LH: loop header
LB: loop body
LE: loop exit
PB: predicated region body
PF: predicated region fallthrough
CT: control target
= control target key end

     0   :  { %10 = vsyncpa [#allocation4], 0  ;;  %s603_s0 = inlined_call_operand.hbm [shape: bf16[16,128], index: 0, kind: input, shape index: {}]   ;;  %s604_s1 = inlined_call_operand.hbm [shape: bf16[128,128], index: 1, kind: input, shape index: {}]   ;;  %s605_s2 = inlined_call_operand.vmem [shape: f32[1,128], index: 2, kind: input, shape index: {}]   ;;  %s606_s3 = inlined_call_operand.hbm [shape: bf16[128,128], index: 3, kind: input, shape index: {}]   ;;  %s607_s4 = inlined_call_operand.vmem [shape: f32[1,128], index: 4, kind: input, shape index: {}]   ;;  %s608_s5 = inlined_call_operand.hbm [shape: f32[16,128], index: 5, kind: output, shape index: {}]  }
   0x1   :  { %11 = vsyncpa [#allocation7], 0 }
   0x2   :  { %12 = vsyncpa [#allocation5], 0  ;;  %s545_s18 = smov [#allocation6]   ;;  %s546_s20 = smov [#allocation3]  }
   0x3   :  { %s30_s19 = sshll.u32 %s545_s18, 4  ;;  %s18_s21 = sshll.u32 %s546_s20, 4  ;;  %s31_s19 = int_to_ptr.vmem [resolvable:$true] %s30_s19  ;;  %s19_s21 = int_to_ptr.vmem [resolvable:$true] %s18_s21 }
   0x4   :  { %s467_s22 = scalar_lea.vmem %s31_s19, 1024  ;;  %p472_p1 = scmp.lt.s32.totalorder %s31_s19, %s31_s19 }
   0x5   :  { %p468_p0 = scmp.ne.s32.totalorder %s31_s19, %s467_s22  ;;  %p473_p2 = scmp.lt.s32.totalorder %s467_s22, %s467_s22 }
   0x7   :  { %p474_p3 = por %p473_p2, %p472_p1 }
   0x9   :  { %p475_p4 = pnand %p474_p3, %p468_p0 }
   0xb   :  { %478 = shalt.err (!%p475_p4)
}
   0xc   :  { %s547_s23 = smov 64   ;;  %s548_s24 = smov 4  }
   0xd   :  { %36 = dma.hbm_to_vmem [thread:$0]  %s604_s1, 1024, %s31_s19, [#allocation7], %s547_s23, %s547_s23, %s548_s24  }
   0xe   :  { %s487_s27 = scalar_lea.vmem %s19_s21, 128  ;;  %p492_p6 = scmp.lt.s32.totalorder %s19_s21, %s19_s21 }
   0xf   :  { %p488_p5 = scmp.ne.s32.totalorder %s19_s21, %s487_s27  ;;  %p493_p7 = scmp.lt.s32.totalorder %s487_s27, %s487_s27 }
  0x11   :  { %p494_p8 = por %p493_p7, %p492_p6 }
  0x13   :  { %p495_p9 = pnand %p494_p8, %p488_p5 }
  0x15   :  { %498 = shalt.err (!%p495_p9)
}
  0x16   :  { %24 = dma.hbm_to_vmem [thread:$0]  %s603_s0, 128, %s19_s21, [#allocation4], %s547_s23, %s547_s23, %s548_s24  }
  0x17   :  { %s549_s30 = smov [#allocation8]  }
  0x18   :  { %s44_s6 = sshll.u32 %s549_s30, 4  ;;  %s45_s6 = int_to_ptr.vmem [resolvable:$true] %s44_s6 }
  0x19   :  { %s507_s7 = scalar_lea.vmem %s45_s6, 1024  ;;  %p512_p11 = scmp.lt.s32.totalorder %s45_s6, %s45_s6 }
  0x1a   :  { %p508_p10 = scmp.ne.s32.totalorder %s45_s6, %s507_s7  ;;  %p513_p12 = scmp.lt.s32.totalorder %s507_s7, %s507_s7 }
  0x1c   :  { %p514_p13 = por %p513_p12, %p512_p11 }
  0x1e   :  { %p515_p0 = pnand %p514_p13, %p508_p10 }
  0x20   :  { %518 = shalt.err (!%p515_p0)
}
  0x21   :  { %50 = dma.hbm_to_vmem [thread:$0]  %s606_s3, 1024, %s45_s6, [#allocation7], %s547_s23, %s547_s23, %s548_s24  }
  0x22   :  { %539 = dma.done.wait [#allocation4], 128  }
  0x23   :  { %540 = vsyncadd [#allocation4], 4294967168 }
  0x24   :  { %541 = dma.done.wait [#allocation7], 2048  }
  0x25   :  { %542 = vsyncadd [#allocation7], 4294965248  ;;  %v550_v0 = vmov 0.0   ;;  %vm551_vm0 = vmmov 0   ;;  %v438_v1 = vld [vmem:[#allocation6 + $0x38] sm:$0xff]   ;;  %v439_v2 = vld [vmem:[#allocation6 + $0x30] sm:$0xff]  }
  0x26   :  { %388 = vmatprep.subr.bf16.mxu0 %v550_v0  ;;  %404 = vmatprep.mubr.msk.bf16.mxu0 %vm551_vm0, %v550_v0  ;;  %v440_v3 = vld [vmem:[#allocation6 + $0x28] sm:$0xff]   ;;  %v447_v4 = vld [vmem:[#allocation8 + $0x38] sm:$0xff]   ;;  %v441_v5 = vld [vmem:[#allocation6 + $0x20] sm:$0xff]   ;;  %s552_s10 = smov [#allocation9]  }
  0x27   :  { %408 = vmatprep.subr.bf16.mxu1 %v550_v0  ;;  %424 = vmatprep.mubr.msk.bf16.mxu1 %vm551_vm0, %v550_v0  ;;  %v442_v6 = vld [vmem:[#allocation6 + $0x18] sm:$0xff]   ;;  %v443_v7 = vld [vmem:[#allocation6 + $0x10] sm:$0xff]   ;;  %v444_v8 = vld [vmem:[#allocation6 + $0x8] sm:$0xff]   ;;  %s338_s11 = sshll.u32 %s552_s10, 4  ;;  %s339_s11 = int_to_ptr.vmem [resolvable:$true] %s338_s11 }
  0x28   :  { %389 = vmatpush3.bf16.msra.mxu0 %v438_v1  ;;  %409 = vmatpush3.bf16.msra.mxu1 %v447_v4  ;;  %v445_v9 = vld [vmem:[#allocation6] sm:$0xff]   ;;  %v446_v10 = vld [vmem:[#allocation3] sm:$0xff]   ;;  %v448_v11 = vld [vmem:[#allocation8 + $0x30] sm:$0xff]   ;;  %s519_s12 = scalar_lea.vmem %s339_s11, 256  ;;  %p524_p2 = scmp.lt.s32.totalorder %s339_s11, %s339_s11 }
  0x29   :  { %390 = vmatprep.subr.bf16.mxu0 %v550_v0  ;;  %410 = vmatprep.subr.bf16.mxu1 %v550_v0  ;;  %v449_v12 = vld [vmem:[#allocation8 + $0x28] sm:$0xff]   ;;  %v450_v13 = vld [vmem:[#allocation8 + $0x20] sm:$0xff]   ;;  %v451_v14 = vld [vmem:[#allocation8 + $0x18] sm:$0xff]   ;;  %p520_p1 = scmp.ne.s32.totalorder %s339_s11, %s519_s12  ;;  %p525_p3 = scmp.lt.s32.totalorder %s519_s12, %s519_s12 }
  0x2a   :  { %v452_v15 = vld [vmem:[#allocation8 + $0x10] sm:$0xff]   ;;  %v453_v16 = vld [vmem:[#allocation8 + $0x8] sm:$0xff]   ;;  %v454_v17 = vld [vmem:[#allocation8] sm:$0xff]  }
  0x2b   :  { %v351_v18 = vld [vmem:[%s605_s2] ss:$0 sm:$0xff]  ;;  %p526_p4 = por %p525_p3, %p524_p2 }
  0x2c   :  { %391 = vmatpush3.bf16.msra.mxu0 %v439_v2  ;;  %411 = vmatpush3.bf16.msra.mxu1 %v448_v11  ;;  %v369_v36 = vld [vmem:[%s607_s4] ss:$0 sm:$0xff] }
  0x2d   :  { %392 = vmatprep.subr.bf16.mxu0 %v550_v0  ;;  %412 = vmatprep.subr.bf16.mxu1 %v550_v0  ;;  %p527_p5 = pnand %p526_p4, %p520_p1 }
  0x30   :  { %393 = vmatpush3.bf16.msra.mxu0 %v440_v3  ;;  %413 = vmatpush3.bf16.msra.mxu1 %v449_v12 }
  0x31   :  { %394 = vmatprep.subr.bf16.mxu0 %v550_v0  ;;  %414 = vmatprep.subr.bf16.mxu1 %v550_v0 }
  0x34   :  { %395 = vmatpush3.bf16.msra.mxu0 %v441_v5  ;;  %415 = vmatpush3.bf16.msra.mxu1 %v450_v13 }
  0x35   :  { %396 = vmatprep.subr.bf16.mxu0 %v550_v0  ;;  %416 = vmatprep.subr.bf16.mxu1 %v550_v0 }
  0x38   :  { %397 = vmatpush3.bf16.msra.mxu0 %v442_v6  ;;  %417 = vmatpush3.bf16.msra.mxu1 %v451_v14 }
  0x39   :  { %398 = vmatprep.subr.bf16.mxu0 %v550_v0  ;;  %418 = vmatprep.subr.bf16.mxu1 %v550_v0 }
  0x3c   :  { %399 = vmatpush3.bf16.msra.mxu0 %v443_v7  ;;  %419 = vmatpush3.bf16.msra.mxu1 %v452_v15 }
  0x3d   :  { %400 = vmatprep.subr.bf16.mxu0 %v550_v0  ;;  %420 = vmatprep.subr.bf16.mxu1 %v550_v0 }
  0x40   :  { %401 = vmatpush3.bf16.msra.mxu0 %v444_v8  ;;  %421 = vmatpush3.bf16.msra.mxu1 %v453_v16 }
  0x41   :  { %402 = vmatprep.subr.bf16.mxu0 %v550_v0  ;;  %422 = vmatprep.subr.bf16.mxu1 %v550_v0 }
  0x44   :  { %403 = vmatpush3.bf16.msra.mxu0 %v445_v9  ;;  %423 = vmatpush3.bf16.msra.mxu1 %v454_v17 }
  0x47   :  { %405 = vmatmul.mubr.bf16.vlgmr.msra.gmra.mxu0 %v446_v10 }
 0x107   :  { %v176_v19 = vpop.f32.mrf.mxu0 }
 0x108   :  { %v177_v20 = vadd.f32 %v351_v18, %v176_v19 }
 0x109   :  { %v406_v21 = vpop.f32.mrf.mxu0 }
 0x10a   :  { %v185_v22 = vmul.f32 0.70710677, %v177_v20  ;;  %v183_v30 = vmul.f32 0.5, %v177_v20 }
 0x10b   :  { %v179_v23 = vpop.f32.mrf.mxu0 }
 0x10c   :  { %455 = verf.f32 %v185_v22  ;;  %v180_v24 = vadd.f32 %v351_v18, %v179_v23 }
 0x10d   :  { %v407_v25 = vpop.f32.mrf.mxu0 }
 0x10e   :  { %v186_v26 = vmul.f32 0.70710677, %v180_v24  ;;  %v184_v31 = vmul.f32 0.5, %v180_v24 }
 0x110   :  { %457 = verf.f32 %v186_v26 }
 0x119   :  { %v456_v27 = vpop.eup %455 }
 0x11a   :  { %v189_v28 = vadd.f32 1.0, %v456_v27 }
 0x11c   :  { %v191_v33 = vmul.f32 %v189_v28, %v183_v30 }
 0x11d   :  { %v458_v29 = vpop.eup %457 }
 0x11e   :  { %v190_v32 = vadd.f32 1.0, %v458_v29 }
 0x120   :  { %v192_v34 = vmul.f32 %v190_v32, %v184_v31 }
 0x122   :  { %v193_v35 = vpack.c.bf16 %v192_v34, %v191_v33 }
 0x124   :  { %425 = vmatmul.mubr.bf16.vlgmr.msra.gmra.mxu1 %v193_v35 }
 0x1e4   :  { %v292_v37 = vpop.f32.mrf.mxu1 }
 0x1e5   :  { %v329_v38 = vadd.f32 %v369_v36, %v292_v37 }
 0x1e6   :  { %v426_v39 = vpop.f32.mrf.mxu1 }
 0x1e7   :  { %331 = vst [vmem:[#allocation9] sm:$0xff] %v329_v38 }
 0x1e8   :  { %v295_v40 = vpop.f32.mrf.mxu1 }
 0x1e9   :  { %v330_v41 = vadd.f32 %v369_v36, %v295_v40 }
 0x1ea   :  { %v427_v42 = vpop.f32.mrf.mxu1 }
 0x1eb   :  { %332 = vst [vmem:[#allocation9 + $0x8] sm:$0xff] %v330_v41 }
 0x1ec   :  { %530 = shalt.err (!%p527_p5)
}
 0x1ed   :  { %s553_s13 = smov 128   ;;  %s554_s4 = smov 8  }
 0x1ee   :  { %344 = dma.vmem_to_hbm [thread:$0]  %s339_s11, 256, %s608_s5, [#allocation5], %s553_s13, %s553_s13, %s554_s4  }
 0x1ef   :  { %543 = dma.done.wait [#allocation5], 256  }
 0x1f0   :  { %544 = vsyncadd [#allocation5], 4294967040 }
 0x1f1   :  { %348 = vsyncpa [#allocation4], 1 }
 0x1f2   :  { %349 = vsyncpa [#allocation7], 1 }
 0x1f3   :  { %350 = vsyncpa [#allocation5], 1 }

</bundles_post_ra>
